<compile_context>
chip_gen: v6e
topology: v6e:2x2x1
jax: 0.10.0
libtpu: 0.0.40
codegen_flags: <defaults>
</compile_context>

<pallas_src>
import jax
import jax.numpy as jnp
from jax.experimental import pallas as pl
from jax.experimental.pallas import tpu as pltpu


# --------------------------- fused kernel (built per static shape) ---------------------------

def _make_kernel(TB, QH1, QW1, OH2, OW2, OH3, OW3, NPOS_PAD):
    npos = OH3 * OW3
    NH = NPOS_PAD // 2

    def kernel(x_ref, w1_ref, w2_ref, w3_ref, b_ref, o_ref):
        # x_ref : (TB, HB, WB, 192) bf16  input space-to-depth'd by 8, lanes=(ry8, rx8, c)
        # w1_ref: (768, 128) bf16         cols (ry, rx, oc) -> conv1 output comes out s2d(2)
        # w2_ref: (512, 64)  bf16         rows (qi, qj, ri, rj, ic); cols oc (64 real, no pad)
        # w3_ref: (576, 64)  bf16         rows (kh, kw, ic);         cols oc
        # b_ref : (3, 128)   f32          per-layer biases; layers 2/3 live in lanes 0..63
        # o_ref : (TB, NH, 128) f32       two output positions packed per 128-lane row
        x = x_ref[...]
        b = b_ref[...]

        # ---- conv1 (8x8, stride 4): 2x2 stride-1 block conv over the s2d(8) bf16 input.
        # Output produced directly in 2x2 space-to-depth layout (lanes = (ry, rx, oc)).
        p1 = jnp.concatenate(
            [x[:, di:di + QH1, dj:dj + QW1, :] for di in range(2) for dj in range(2)],
            axis=-1).reshape(TB * QH1 * QW1, -1)                       # (M1, 768) bf16
        a1 = jnp.dot(p1, w1_ref[...], preferred_element_type=jnp.float32)
        a1 = jnp.maximum(a1 + b[0:1, :], 0.0)                          # (M1, 128) f32
        a1 = a1.astype(jnp.bfloat16).reshape(TB, QH1, QW1, 128)

        # ---- conv2 (4x4, stride 2): 2x2 stride-1 block conv over the s2d(2) bf16 activation.
        p2 = jnp.concatenate(
            [a1[:, di:di + OH2, dj:dj + OW2, :] for di in range(2) for dj in range(2)],
            axis=-1).reshape(TB * OH2 * OW2, -1)                       # (M2, 512) bf16
        a2 = jnp.dot(p2, w2_ref[...], preferred_element_type=jnp.float32)
        a2 = jnp.maximum(a2 + b[1:2, :64], 0.0)                        # (M2, 64) f32
        a2 = a2.astype(jnp.bfloat16).reshape(TB, OH2, OW2, 64)

        # ---- conv3 (3x3, stride 1): plain patch-concat matmul, only the 64 real channels.
        p3 = jnp.concatenate(
            [a2[:, di:di + OH3, dj:dj + OW3, :] for di in range(3) for dj in range(3)],
            axis=-1).reshape(TB * OH3 * OW3, -1)                       # (M3, 576) bf16
        a3 = jnp.dot(p3, w3_ref[...], preferred_element_type=jnp.float32)
        a3 = jnp.maximum(a3 + b[2:3, :64], 0.0)                        # (M3, 64) f32

        # ---- pack two output positions per 128-lane row (unmasked, zero-free writeback):
        # positions [0, NH) in lanes 0..63, positions [NH, 2*NH) in lanes 64..127.
        a3 = a3.reshape(TB, npos, 64)
        if NPOS_PAD != npos:
            a3 = jnp.concatenate(
                [a3, jnp.zeros((TB, NPOS_PAD - npos, 64), jnp.float32)], axis=1)
        o_ref[...] = jnp.concatenate([a3[:, :NH, :], a3[:, NH:, :]], axis=-1)

    return kernel


# --------------------------- weight re-layout (tiny, done in XLA) ---------------------------

def _prep_weights(params):
    w1, b1 = params["w1"], params["b1"]      # (32, 3, 8, 8), (32,)
    w2, b2 = params["w2"], params["b2"]      # (64, 32, 4, 4), (64,)
    w3, b3 = params["w3"], params["b3"]      # (64, 64, 3, 3), (64,)

    # conv1: fold the stride-4 8x8 kernel into a 2x2 block conv over the s2d(8) input.
    # Four output parity classes (ry, rx) are packed side-by-side into 128 lanes so the
    # activation comes out already space-to-depth'd by 2 for conv2.
    w1_k = jnp.transpose(w1, (2, 3, 1, 0))                              # (8,8,3,32) (kh,kw,c,oc)
    cls_cols = []
    for ry in range(2):
        for rx in range(2):
            pad = jnp.pad(w1_k, ((4 * ry, 8 - 4 * ry), (4 * rx, 8 - 4 * rx),
                                 (0, 0), (0, 0)))                       # (16,16,3,32)
            pad = pad.reshape(2, 8, 2, 8, 3, 32).transpose(0, 2, 1, 3, 4, 5)
            cls_cols.append(pad.reshape(2 * 2 * 8 * 8 * 3, 32))         # rows (dby,dbx,ry8,rx8,c)
    w1m = jnp.concatenate(cls_cols, axis=1)                             # (768, 128)
    b1m = jnp.tile(b1, 4)                                               # (128,)

    # conv2: stride-2 4x4 kernel over the s2d(2) activation -> 2x2 block conv, K = 512, N = 64.
    w2_k = jnp.transpose(w2, (2, 3, 1, 0))                              # (4,4,32,64)
    w2m = w2_k.reshape(2, 2, 2, 2, 32, 64).transpose(0, 2, 1, 3, 4, 5).reshape(512, 64)

    # conv3: plain 3x3 stride-1, K = 576, N = 64.
    w3m = jnp.transpose(w3, (2, 3, 1, 0)).reshape(576, 64)

    # Biases stacked into one (3, 128) f32 tile; layers 2/3 occupy lanes 0..63.
    b2m = jnp.pad(b2, (0, 64))
    b3m = jnp.pad(b3, (0, 64))
    bm = jnp.stack([b1m, b2m, b3m], axis=0).astype(jnp.float32)         # (3, 128)
    return (w1m.astype(jnp.bfloat16), w2m.astype(jnp.bfloat16),
            w3m.astype(jnp.bfloat16), bm)


def _pick_batch_tile(B):
    if B <= 1:
        return 1
    # >= 2 grid steps so both v7x TensorCores get work; cap the tile at 16 so the per-step
    # working set (intermediates + double-buffered input tile) stays well inside v7x's 64 MiB.
    return min(16, -(-B // 2))


# ------------------------------------ public forward pass -----------------------------------

def cnn_feature_extractor(params, x_nchw):
    B, C, H, W = x_nchw.shape
    assert C == 3
    OH1, OW1 = (H - 8) // 4 + 1, (W - 8) // 4 + 1
    OH2, OW2 = (OH1 - 4) // 2 + 1, (OW1 - 4) // 2 + 1
    OH3, OW3 = OH2 - 2, OW2 - 2
    # TODO(synk): odd conv1 output grids would need one row/col of parity-class padding.
    assert OH1 % 2 == 0 and OW1 % 2 == 0 and OH3 >= 1 and OW3 >= 1
    QH1, QW1 = OH1 // 2, OW1 // 2

    TB = _pick_batch_tile(B)
    B_pad = -(-B // TB) * TB          # pad batch up instead of degrading the tile

    # bf16 cast first, then one NHWC transpose + zero-expansion space-to-depth(8); no HBM im2col.
    x = jnp.transpose(x_nchw.astype(jnp.bfloat16), (0, 2, 3, 1))
    Hp, Wp = -(-H // 8) * 8, -(-W // 8) * 8
    x = jnp.pad(x, ((0, B_pad - B), (0, Hp - H), (0, Wp - W), (0, 0)))
    HB, WB = Hp // 8, Wp // 8
    xs8 = (x.reshape(B_pad, HB, 8, WB, 8, C)
             .transpose(0, 1, 3, 2, 4, 5)
             .reshape(B_pad, HB, WB, 64 * C))                          # (B_pad, HB, WB, 192) bf16

    w1m, w2m, w3m, bm = _prep_weights(params)

    npos = OH3 * OW3
    NPOS_PAD = npos + (npos % 2)
    NH = NPOS_PAD // 2
    kernel = _make_kernel(TB, QH1, QW1, OH2, OW2, OH3, OW3, NPOS_PAD)

    flops = 2 * B_pad * (QH1 * QW1 * 768 * 128
                         + OH2 * OW2 * 512 * 64
                         + OH3 * OW3 * 576 * 64)
    bytes_accessed = (xs8.size * 2 + (w1m.size + w2m.size + w3m.size) * 2
                      + bm.size * 4 + B_pad * NH * 128 * 4)

    out = pl.pallas_call(
        kernel,
        out_shape=jax.ShapeDtypeStruct((B_pad, NH, 128), jnp.float32),
        grid=(B_pad // TB,),
        in_specs=[
            pl.BlockSpec((TB, HB, WB, 64 * C), lambda g: (g, 0, 0, 0)),
            pl.BlockSpec((768, 128), lambda g: (0, 0)),
            pl.BlockSpec((512, 64), lambda g: (0, 0)),
            pl.BlockSpec((576, 64), lambda g: (0, 0)),
            pl.BlockSpec((3, 128), lambda g: (0, 0)),
        ],
        out_specs=pl.BlockSpec((TB, NH, 128), lambda g: (g, 0, 0)),
        compiler_params=pltpu.CompilerParams(
            dimension_semantics=("parallel",),
            vmem_limit_bytes=64 * 1024 * 1024),
        cost_estimate=pl.CostEstimate(
            flops=flops, transcendentals=0, bytes_accessed=bytes_accessed),
    )(xs8, w1m, w2m, w3m, bm)

    # Unpack the two-positions-per-row lane packing, strip batch/position padding, and
    # reproduce PyTorch's NCHW flatten order.
    feats = jnp.concatenate([out[..., :64], out[..., 64:]], axis=1)    # (B_pad, NPOS_PAD, 64)
    feats = feats[:B, :npos, :].reshape(B, OH3, OW3, 64)
    feats = jnp.transpose(feats, (0, 3, 1, 2)).reshape(B, -1)
    return feats


# --------------------------- deterministic parameter creation ---------------------------

def init_params(key):
    ks = jax.random.split(key, 6)

    def kaiming_uniform(k, shape, fan_in):
        bound = 1.0 / jnp.sqrt(jnp.float32(fan_in))
        return jax.random.uniform(k, shape, jnp.float32, -bound, bound)

    return {
        "w1": kaiming_uniform(ks[0], (32, 3, 8, 8), 3 * 8 * 8),
        "b1": kaiming_uniform(ks[1], (32,), 3 * 8 * 8),
        "w2": kaiming_uniform(ks[2], (64, 32, 4, 4), 32 * 4 * 4),
        "b2": kaiming_uniform(ks[3], (64,), 32 * 4 * 4),
        "w3": kaiming_uniform(ks[4], (64, 64, 3, 3), 64 * 3 * 3),
        "b3": kaiming_uniform(ks[5], (64,), 64 * 3 * 3),
    }


# ------------------------------ pure-JAX reference check ------------------------------

def _reference(params, x):
    def conv(x, w, b, s):
        y = jax.lax.conv_general_dilated(
            x, w, window_strides=(s, s), padding="VALID",
            dimension_numbers=("NCHW", "OIHW", "NCHW"),
            precision=jax.lax.Precision.HIGHEST)
        return jax.nn.relu(y + b[None, :, None, None])

    x = conv(x, params["w1"], params["b1"], 4)
    x = conv(x, params["w2"], params["b2"], 2)
    x = conv(x, params["w3"], params["b3"], 1)
    return x.reshape(x.shape[0], -1)


if __name__ == "__main__":
    key = jax.random.PRNGKey(0)
    pkey, xkey = jax.random.split(key)
    params = init_params(pkey)

    # NCHW, 3 input channels. 36x36 -> conv1: 8x8 -> conv2: 3x3 -> conv3: 1x1 -> 64 features.
    x = jax.random.normal(xkey, (2, 3, 36, 36), dtype=jnp.float32)

    feats = jax.jit(cnn_feature_extractor)(params, x)
    feats = jax.block_until_ready(feats)

    assert feats.shape == (2, 64), feats.shape

    ref = _reference(params, x)
    # bf16 MXU operands with f32 accumulation -> small relative error vs f32 reference.
    assert jnp.allclose(feats, ref, rtol=3e-2, atol=3e-2), "mismatch vs JAX reference"

    print("KERNEL_OK")
</pallas_src>

<mosaic_0001>
module attributes {stable_mosaic.version = 11 : i64} {
  func.func @kernel(%arg0: i32, %arg1: memref<1x5x5x192xbf16, #tpu.memory_space<vmem>>, %arg2: memref<768x128xbf16, #tpu.memory_space<vmem>>, %arg3: memref<512x64xbf16, #tpu.memory_space<vmem>>, %arg4: memref<576x64xbf16, #tpu.memory_space<vmem>>, %arg5: memref<3x128xf32, #tpu.memory_space<vmem>>, %arg6: memref<1x1x128xf32, #tpu.memory_space<vmem>>) attributes {dimension_semantics = [#tpu.dimension_semantics<parallel>], iteration_bounds = array<i64: 2>, scalar_prefetch = 0 : i64, scratch_operands = 0 : i64, tpu.core_type = #tpu.core_type<tc>, window_params = [{transform_indices = @transform_0, window_bounds = array<i64: 1, 5, 5, 192>}, {pipeline_mode = #tpu.pipeline_mode<synchronous>, transform_indices = @transform_1, window_bounds = array<i64: 768, 128>}, {pipeline_mode = #tpu.pipeline_mode<synchronous>, transform_indices = @transform_2, window_bounds = array<i64: 512, 64>}, {pipeline_mode = #tpu.pipeline_mode<synchronous>, transform_indices = @transform_3, window_bounds = array<i64: 576, 64>}, {pipeline_mode = #tpu.pipeline_mode<synchronous>, transform_indices = @transform_4, window_bounds = array<i64: 3, 128>}, {transform_indices = @transform_5, window_bounds = array<i64: 1, 1, 128>}]} {
    %c0 = arith.constant 0 : index
    %c0_0 = arith.constant 0 : index
    %c0_1 = arith.constant 0 : index
    %c0_2 = arith.constant 0 : index
    %0 = vector.load %arg1[%c0, %c0_0, %c0_1, %c0_2] : memref<1x5x5x192xbf16, #tpu.memory_space<vmem>>, vector<1x5x5x192xbf16>
    %c0_3 = arith.constant 0 : index
    %c0_4 = arith.constant 0 : index
    %1 = vector.load %arg5[%c0_3, %c0_4] : memref<3x128xf32, #tpu.memory_space<vmem>>, vector<3x128xf32>
    %2 = vector.extract_strided_slice %0 {offsets = [0, 0, 0, 0], sizes = [1, 4, 4, 192], strides = [1, 1, 1, 1]} : vector<1x5x5x192xbf16> to vector<1x4x4x192xbf16>
    %3 = vector.extract_strided_slice %0 {offsets = [0, 0, 1, 0], sizes = [1, 4, 4, 192], strides = [1, 1, 1, 1]} : vector<1x5x5x192xbf16> to vector<1x4x4x192xbf16>
    %4 = vector.extract_strided_slice %0 {offsets = [0, 1, 0, 0], sizes = [1, 4, 4, 192], strides = [1, 1, 1, 1]} : vector<1x5x5x192xbf16> to vector<1x4x4x192xbf16>
    %5 = vector.extract_strided_slice %0 {offsets = [0, 1, 1, 0], sizes = [1, 4, 4, 192], strides = [1, 1, 1, 1]} : vector<1x5x5x192xbf16> to vector<1x4x4x192xbf16>
    %6 = tpu.concatenate %2, %3, %4, %5 in 3 : vector<1x4x4x192xbf16>, vector<1x4x4x192xbf16>, vector<1x4x4x192xbf16>, vector<1x4x4x192xbf16> -> vector<1x4x4x768xbf16>
    %7 = vector.shape_cast %6 : vector<1x4x4x768xbf16> to vector<16x768xbf16>
    %c0_5 = arith.constant 0 : index
    %c0_6 = arith.constant 0 : index
    %8 = vector.load %arg2[%c0_5, %c0_6] : memref<768x128xbf16, #tpu.memory_space<vmem>>, vector<768x128xbf16>
    %cst = arith.constant dense<0.000000e+00> : vector<16x128xf32>
    %9 = tpu.matmul %7, %8, %cst {dimension_numbers = #tpu.dot_dimension_numbers<[1], [0], [0], [1], [0, 0, 1, 1], [], []>} : vector<16x768xbf16>, vector<768x128xbf16>, vector<16x128xf32> -> vector<16x128xf32>
    %10 = vector.extract_strided_slice %1 {offsets = [0, 0], sizes = [1, 128], strides = [1, 1]} : vector<3x128xf32> to vector<1x128xf32>
    %11 = vector.broadcast %10 : vector<1x128xf32> to vector<16x128xf32>
    %12 = arith.addf %9, %11 : vector<16x128xf32>
    %cst_7 = arith.constant 0.000000e+00 : f32
    %13 = vector.broadcast %cst_7 : f32 to vector<16x128xf32>
    %14 = arith.maximumf %12, %13 : vector<16x128xf32>
    %15 = arith.truncf %14 : vector<16x128xf32> to vector<16x128xbf16>
    %16 = vector.shape_cast %15 : vector<16x128xbf16> to vector<1x4x4x128xbf16>
    %17 = vector.extract_strided_slice %16 {offsets = [0, 0, 0, 0], sizes = [1, 3, 3, 128], strides = [1, 1, 1, 1]} : vector<1x4x4x128xbf16> to vector<1x3x3x128xbf16>
    %18 = vector.extract_strided_slice %16 {offsets = [0, 0, 1, 0], sizes = [1, 3, 3, 128], strides = [1, 1, 1, 1]} : vector<1x4x4x128xbf16> to vector<1x3x3x128xbf16>
    %19 = vector.extract_strided_slice %16 {offsets = [0, 1, 0, 0], sizes = [1, 3, 3, 128], strides = [1, 1, 1, 1]} : vector<1x4x4x128xbf16> to vector<1x3x3x128xbf16>
    %20 = vector.extract_strided_slice %16 {offsets = [0, 1, 1, 0], sizes = [1, 3, 3, 128], strides = [1, 1, 1, 1]} : vector<1x4x4x128xbf16> to vector<1x3x3x128xbf16>
    %21 = tpu.concatenate %17, %18, %19, %20 in 3 : vector<1x3x3x128xbf16>, vector<1x3x3x128xbf16>, vector<1x3x3x128xbf16>, vector<1x3x3x128xbf16> -> vector<1x3x3x512xbf16>
    %22 = vector.shape_cast %21 : vector<1x3x3x512xbf16> to vector<9x512xbf16>
    %c0_8 = arith.constant 0 : index
    %c0_9 = arith.constant 0 : index
    %23 = vector.load %arg3[%c0_8, %c0_9] : memref<512x64xbf16, #tpu.memory_space<vmem>>, vector<512x64xbf16>
    %cst_10 = arith.constant dense<0.000000e+00> : vector<9x64xf32>
    %24 = tpu.matmul %22, %23, %cst_10 {dimension_numbers = #tpu.dot_dimension_numbers<[1], [0], [0], [1], [0, 0, 1, 1], [], []>} : vector<9x512xbf16>, vector<512x64xbf16>, vector<9x64xf32> -> vector<9x64xf32>
    %25 = vector.extract_strided_slice %1 {offsets = [1, 0], sizes = [1, 64], strides = [1, 1]} : vector<3x128xf32> to vector<1x64xf32>
    %26 = vector.broadcast %25 : vector<1x64xf32> to vector<9x64xf32>
    %27 = arith.addf %24, %26 : vector<9x64xf32>
    %cst_11 = arith.constant 0.000000e+00 : f32
    %28 = vector.broadcast %cst_11 : f32 to vector<9x64xf32>
    %29 = arith.maximumf %27, %28 : vector<9x64xf32>
    %30 = arith.truncf %29 : vector<9x64xf32> to vector<9x64xbf16>
    %31 = vector.shape_cast %30 : vector<9x64xbf16> to vector<1x3x3x64xbf16>
    %32 = vector.extract_strided_slice %31 {offsets = [0, 0, 0, 0], sizes = [1, 1, 1, 64], strides = [1, 1, 1, 1]} : vector<1x3x3x64xbf16> to vector<1x1x1x64xbf16>
    %33 = vector.extract_strided_slice %31 {offsets = [0, 0, 1, 0], sizes = [1, 1, 1, 64], strides = [1, 1, 1, 1]} : vector<1x3x3x64xbf16> to vector<1x1x1x64xbf16>
    %34 = vector.extract_strided_slice %31 {offsets = [0, 0, 2, 0], sizes = [1, 1, 1, 64], strides = [1, 1, 1, 1]} : vector<1x3x3x64xbf16> to vector<1x1x1x64xbf16>
    %35 = vector.extract_strided_slice %31 {offsets = [0, 1, 0, 0], sizes = [1, 1, 1, 64], strides = [1, 1, 1, 1]} : vector<1x3x3x64xbf16> to vector<1x1x1x64xbf16>
    %36 = vector.extract_strided_slice %31 {offsets = [0, 1, 1, 0], sizes = [1, 1, 1, 64], strides = [1, 1, 1, 1]} : vector<1x3x3x64xbf16> to vector<1x1x1x64xbf16>
    %37 = vector.extract_strided_slice %31 {offsets = [0, 1, 2, 0], sizes = [1, 1, 1, 64], strides = [1, 1, 1, 1]} : vector<1x3x3x64xbf16> to vector<1x1x1x64xbf16>
    %38 = vector.extract_strided_slice %31 {offsets = [0, 2, 0, 0], sizes = [1, 1, 1, 64], strides = [1, 1, 1, 1]} : vector<1x3x3x64xbf16> to vector<1x1x1x64xbf16>
    %39 = vector.extract_strided_slice %31 {offsets = [0, 2, 1, 0], sizes = [1, 1, 1, 64], strides = [1, 1, 1, 1]} : vector<1x3x3x64xbf16> to vector<1x1x1x64xbf16>
    %40 = vector.extract_strided_slice %31 {offsets = [0, 2, 2, 0], sizes = [1, 1, 1, 64], strides = [1, 1, 1, 1]} : vector<1x3x3x64xbf16> to vector<1x1x1x64xbf16>
    %41 = tpu.concatenate %32, %33, %34, %35, %36, %37, %38, %39, %40 in 3 : vector<1x1x1x64xbf16>, vector<1x1x1x64xbf16>, vector<1x1x1x64xbf16>, vector<1x1x1x64xbf16>, vector<1x1x1x64xbf16>, vector<1x1x1x64xbf16>, vector<1x1x1x64xbf16>, vector<1x1x1x64xbf16>, vector<1x1x1x64xbf16> -> vector<1x1x1x576xbf16>
    %42 = vector.shape_cast %41 : vector<1x1x1x576xbf16> to vector<1x576xbf16>
    %c0_12 = arith.constant 0 : index
    %c0_13 = arith.constant 0 : index
    %43 = vector.load %arg4[%c0_12, %c0_13] : memref<576x64xbf16, #tpu.memory_space<vmem>>, vector<576x64xbf16>
    %cst_14 = arith.constant dense<0.000000e+00> : vector<1x64xf32>
    %44 = tpu.matmul %42, %43, %cst_14 {dimension_numbers = #tpu.dot_dimension_numbers<[1], [0], [0], [1], [0, 0, 1, 1], [], []>} : vector<1x576xbf16>, vector<576x64xbf16>, vector<1x64xf32> -> vector<1x64xf32>
    %45 = vector.extract_strided_slice %1 {offsets = [2, 0], sizes = [1, 64], strides = [1, 1]} : vector<3x128xf32> to vector<1x64xf32>
    %46 = arith.addf %44, %45 : vector<1x64xf32>
    %cst_15 = arith.constant 0.000000e+00 : f32
    %47 = vector.broadcast %cst_15 : f32 to vector<1x64xf32>
    %48 = arith.maximumf %46, %47 : vector<1x64xf32>
    %49 = vector.shape_cast %48 : vector<1x64xf32> to vector<1x1x64xf32>
    %cst_16 = arith.constant 0.000000e+00 : f32
    %50 = vector.broadcast %cst_16 : f32 to vector<1x1x64xf32>
    %51 = tpu.concatenate %49, %50 in 1 : vector<1x1x64xf32>, vector<1x1x64xf32> -> vector<1x2x64xf32>
    %52 = vector.extract_strided_slice %51 {offsets = [0, 0, 0], sizes = [1, 1, 64], strides = [1, 1, 1]} : vector<1x2x64xf32> to vector<1x1x64xf32>
    %53 = vector.extract_strided_slice %51 {offsets = [0, 1, 0], sizes = [1, 1, 64], strides = [1, 1, 1]} : vector<1x2x64xf32> to vector<1x1x64xf32>
    %54 = tpu.concatenate %52, %53 in 2 : vector<1x1x64xf32>, vector<1x1x64xf32> -> vector<1x1x128xf32>
    %c0_17 = arith.constant 0 : index
    %c0_18 = arith.constant 0 : index
    %c0_19 = arith.constant 0 : index
    %55 = vector.load %arg6[%c0_17, %c0_18, %c0_19] : memref<1x1x128xf32, #tpu.memory_space<vmem>>, vector<1x1x128xf32>
    tpu.vector_store %arg6[%c0_17, %c0_18, %c0_19], %54 {strides = array<i32>} : memref<1x1x128xf32, #tpu.memory_space<vmem>>, vector<1x1x128xf32>,
    return
  }
  func.func @transform_0(%arg0: i32) -> (i32, i32, i32, i32) {
    %c0_i32 = arith.constant 0 : i32
    %c0_i32_0 = arith.constant 0 : i32
    %c0_i32_1 = arith.constant 0 : i32
    %c0_i32_2 = arith.constant 0 : i32
    return %arg0, %c0_i32, %c0_i32_0, %c0_i32_1 : i32, i32, i32, i32
  }
  func.func @transform_1(%arg0: i32) -> (i32, i32) {
    %c0_i32 = arith.constant 0 : i32
    %c0_i32_0 = arith.constant 0 : i32
    %c0_i32_1 = arith.constant 0 : i32
    return %c0_i32, %c0_i32_0 : i32, i32
  }
  func.func @transform_2(%arg0: i32) -> (i32, i32) {
    %c0_i32 = arith.constant 0 : i32
    %c0_i32_0 = arith.constant 0 : i32
    %c0_i32_1 = arith.constant 0 : i32
    return %c0_i32, %c0_i32_0 : i32, i32
  }
  func.func @transform_3(%arg0: i32) -> (i32, i32) {
    %c0_i32 = arith.constant 0 : i32
    %c0_i32_0 = arith.constant 0 : i32
    %c0_i32_1 = arith.constant 0 : i32
    return %c0_i32, %c0_i32_0 : i32, i32
  }
  func.func @transform_4(%arg0: i32) -> (i32, i32) {
    %c0_i32 = arith.constant 0 : i32
    %c0_i32_0 = arith.constant 0 : i32
    %c0_i32_1 = arith.constant 0 : i32
    return %c0_i32, %c0_i32_0 : i32, i32
  }
  func.func @transform_5(%arg0: i32) -> (i32, i32, i32) {
    %c0_i32 = arith.constant 0 : i32
    %c0_i32_0 = arith.constant 0 : i32
    %c0_i32_1 = arith.constant 0 : i32
    return %arg0, %c0_i32, %c0_i32_0 : i32, i32, i32
  }
}

</mosaic_0001>

<bundles_post_ra>
// kernel: tile.8
= control target key start
LH: loop header
LB: loop body
LE: loop exit
PB: predicated region body
PF: predicated region fallthrough
CT: control target
= control target key end

     0   :  { %s22_s0 = inlined_call_operand.vmem [shape: f32[32], index: 0, kind: input, shape index: {}]   ;;  %s23_s1 = inlined_call_operand.vmem [shape: f32[4,32], index: 1, kind: output, shape index: {}]  }
   0x1   :  { %v4_v0 = vld [vmem:[%s22_s0] ss:$0 sm:$0xff] }
   0x2   :  { %5 = vst [vmem:[%s23_s1] sm:$0xf] %v4_v0 }

// kernel: tile.9
= control target key start
LH: loop header
LB: loop body
LE: loop exit
PB: predicated region body
PF: predicated region fallthrough
CT: control target
= control target key end

     0   :  { %vm8_vm0 = vcmask 261120   ;;  %s40_s8 = smov 32   ;;  %s41_s9 = smov 64   ;;  %vm14_vm1 = vcmask 1048320   ;;  %vm20_vm2 = vcmask 785920   ;;  %vm26_vm3 = vcmask 523520   ;;  %s58_s0 = inlined_call_operand.vmem [shape: f32[4,32], index: 0, kind: input, shape index: {}]   ;;  %s59_s1 = inlined_call_operand.vmem [shape: f32[1,128], index: 1, kind: output, shape index: {}]  }
   0x1   :  { %v5_v0 = vld [vmem:[%s58_s0] sm:$0xf]  ;;  %s39_s0 = smov 96  }
   0x2   :  { %6 = vst [vmem:[#allocation1] sm:$0xf] %v5_v0 }
   0x9   :  { %v11_v1 = vld [vmem:[#allocation1 + $0x3] sm:$0x1]   ;;  %v23_v2 = vld [vmem:[#allocation1 + $0x1] sm:$0x1]   ;;  %v7_v3 = vld [vmem:[#allocation1] sm:$0x1]  }
   0xa   :  { %12 = vrot.lane.b32.xlu0 %v11_v1, %s39_s0  ;;  %24 = vrot.lane.b32.xlu1 %v23_v2, %s40_s8  ;;  %v17_v4 = vld [vmem:[#allocation1 + $0x2] sm:$0x1]   ;;  %9 = vst.msk [vmem:[#allocation0] sm:$0x1] %vm8_vm0, %v7_v3  }
   0xe   :  { %18 = vrot.lane.b32.xlu0 %v17_v4, %s41_s9 }
  0x7c   :  { %v13_v5 = vpop.permute.xlu0 %12   ;;  %v25_v6 = vpop.permute.xlu1 %24  }
  0x7d   :  { %15 = vst.msk [vmem:[#allocation0] sm:$0x1] %vm14_vm1, %v13_v5  }
  0x80   :  { %v19_v7 = vpop.permute.xlu0 %18  }
  0x81   :  { %21 = vst.msk [vmem:[#allocation0] sm:$0x1] %vm20_vm2, %v19_v7  }
  0x82   :  { %27 = vst.msk [vmem:[#allocation0] sm:$0x1] %vm26_vm3, %v25_v6  }
  0x89   :  { %v32_v8 = vld [vmem:[#allocation0] sm:$0x1] }
  0x8a   :  { %35 = vst [vmem:[%s59_s1] sm:$0x1] %v32_v8 }

// kernel: cnn_feature_extractor.1
= control target key start
LH: loop header
LB: loop body
LE: loop exit
PB: predicated region body
PF: predicated region fallthrough
CT: control target
= control target key end

     0   :  { %10 = vsyncpa [#allocation3], 0  ;;  %s3306_s0 = inlined_call_operand.vmem [shape: bf16[2,5,5,192], index: 0, kind: input, shape index: {}]   ;;  %s3307_s1 = inlined_call_operand.vmem [shape: bf16[768,128], index: 1, kind: input, shape index: {}]   ;;  %s3308_s2 = inlined_call_operand.vmem [shape: bf16[512,64], index: 2, kind: input, shape index: {}]   ;;  %s3309_s3 = inlined_call_operand.vmem [shape: bf16[576,64], index: 3, kind: input, shape index: {}]   ;;  %s3310_s4 = inlined_call_operand.vmem [shape: f32[3,128], index: 4, kind: input, shape index: {}]   ;;  %s3311_s5 = inlined_call_operand.hbm [shape: f32[2,1,128], index: 5, kind: output, shape index: {}]  }
   0x1   :  { %12 = vsyncpa [#allocation3 + $0x1], 0  ;;  %s2731_s18 = smov 0   ;;  %s2733_s19 = smov 0  }
   0x2   :  { %s2735_s20 = smov 0   ;;  %s2737_s21 = smov 0  }
   0x3 LB: > { %s2752_s22 = sadd.s32 4294967295, %s2693_s21   ;;  %s2141_s23 = sadd.s32 4294967294, %s2693_s21   ;;  %s2693_s21 = sphi %s2737_s21, %s3317_s21   ;;  %s2689_s20 = sphi %s2735_s20, %s3316_s20   ;;  %s2685_s19 = sphi %s2733_s19, %s3315_s19   ;;  %s2681_s18 = sphi %s2731_s18, %s3314_s18  }
   0x4   : > { %s2756_s24 = sadd.s32 1, %s2693_s21   ;;  %s135_s25 = sadd.s32 1, %s2689_s20 }
   0x5   : > { %s132_s26 = ssub.s32 %s2693_s21, %s2756_s24  ;;  %p145_p0 = scmp.ne.s32.totalorder %s2689_s20, %s2685_s19 }
   0x6   : > { %p133_p1 = scmp.eq.s32.totalorder %s132_s26, 0  ;;  %p146_p2 = scmp.eq.s32.totalorder %s2752_s22, 1 }
   0x7   : > { %p151_p3 = scmp.ne.s32.totalorder %s2685_s19, %s2681_s18  ;;  %p152_p4 = scmp.eq.s32.totalorder %s2141_s23, 1 }
   0x8   : > { %s2767_s27 = scalar_select %p133_p1, %s2689_s20, %s135_s25  }
   0x9   : > { %p2769_p5 = por %p146_p2, %p145_p0  ;;  %p2773_p6 = por %p152_p4, %p151_p3 }
   0xa   : > { %p2144_p7 = scmp.ge.s32.totalorder %s2693_s21, 1  ;;  %p190_p8 = scmp.lt.s32.totalorder %s2693_s21, 3 }
   0xc   : > { %p191_p9 = pnand %p2144_p7, %p190_p8 }
   0xd   : > { %p217_p10 = scmp.lt.s32.totalorder (!%p191_p9), %s2752_s22, 1  ;;  %s2695_s23 = smov (!%p191_p9), 64  }
   0xe   : > { %194 = sbr.rel (%p191_p9) target bundleno = 1114 (0x45a), region = 40  ;;  %s2288_s26 = sshll.u32 (!%p191_p9), %s2752_s22, 4 }
   0xf   : > { %s3270_s9 = scalar_lea.hbm (!%p191_p9), %s3311_s5, %s2288_s26 }
  0x13   : > { %v2517_v0 = vld [vmem:[%s3307_s1 + $0x78] sm:$0xff]   ;;  %s218_s7 = scalar_select %p217_p10, %s2752_s22, 1  ;;  %v2519_v2 = vld [vmem:[%s3307_s1 + $0x70] sm:$0xff]   ;;  %v2521_v4 = vld [vmem:[%s3307_s1 + $0x68] sm:$0xff]   ;;  %vm321_vm0 = vcmask 523264   ;;  %vm2699_vm1 = vmmov 0  }
  0x14   : > { %v2518_v1 = vld [vmem:[%s3307_s1 + $0x38] sm:$0xff]   ;;  %2291 = vmatprep.subr.bf16.mxu0 %v2517_v0  ;;  %v2520_v3 = vld [vmem:[%s3307_s1 + $0x30] sm:$0xff]   ;;  %v2522_v12 = vld [vmem:[%s3307_s1 + $0x28] sm:$0xff]   ;;  %vm2064_vm2 = vcmask 1040384  }
  0x15   : > { %s2462_s12 = smul.u32 40, %s218_s7  ;;  %2292 = vmatpush3.bf16.msra.mxu0 %v2518_v1  ;;  %v2523_v13 = vld [vmem:[%s3307_s1 + $0xf8] sm:$0xff]   ;;  %v2525_v32 = vld [vmem:[%s3307_s1 + $0x60] sm:$0xff]   ;;  %v2527_v44 = vld [vmem:[%s3307_s1 + $0xf0] sm:$0xff]  }
  0x16   : > { %2293 = vmatprep.subr.bf16.mxu0 %v2519_v2  ;;  %v2524_v18 = vld [vmem:[%s3307_s1 + $0xb8] sm:$0xff]   ;;  %2313 = vmatprep.subr.bf16.mxu1 %v2523_v13  ;;  %v2526_v36 = vld [vmem:[%s3307_s1 + $0x20] sm:$0xff]   ;;  %v2528_v45 = vld [vmem:[%s3307_s1 + $0xb0] sm:$0xff]  }
  0x17   : > { %s221_s25 = scalar_lea.vmem %s3306_s0, %s2462_s12  ;;  %2314 = vmatpush3.bf16.msra.mxu1 %v2524_v18  ;;  %v2529_v51 = vld [vmem:[%s3307_s1 + $0x58] sm:$0xff]   ;;  %v2531_v61 = vld [vmem:[%s3307_s1 + $0xe8] sm:$0xff]   ;;  %v2533_v1 = vld [vmem:[%s3307_s1 + $0x50] sm:$0xff]  }
  0x18   : > { %v2799_v5 = vld [vmem:[%s221_s25 + $0x10] sm:$0x77]  ;;  %v2801_v6 = vld [vmem:[%s221_s25] sm:$0x77]  ;;  %v2803_v7 = vld [vmem:[%s221_s25 + $0x18] sm:$0x77]  ;;  %2315 = vmatprep.subr.bf16.mxu1 %v2527_v44 }
  0x19   : > { %v2150_v8 = vcombine.low %v2799_v5, %v2799_v5  ;;  %v2146_v9 = vcombine.low %v2801_v6, %v2801_v6  ;;  %v2152_v10 = vcombine.low %v2803_v7, %v2803_v7  ;;  %v2811_v11 = vld [vmem:[%s221_s25 + $0x8] sm:$0x77]  ;;  %2294 = vmatpush3.bf16.msra.mxu0 %v2520_v3  ;;  %v2821_v14 = vcombine.high %v2801_v6, %v2801_v6  ;;  %v2840_v27 = vld [vmem:[%s221_s25 + $0x20] sm:$0x77]  ;;  %v2530_v54 = vld [vmem:[%s3307_s1 + $0x18] sm:$0xff]   ;;  %s215_s25 = sand.u32 1, %s2685_s19  }
  0x1a   : > { %v2148_v15 = vcombine.low %v2811_v11, %v2811_v11  ;;  %v2827_v16 = vcombine.high %v2811_v11, %v2811_v11  ;;  %v2831_v17 = vcombine.high %v2803_v7, %v2803_v7  ;;  %2295 = vmatprep.subr.bf16.mxu0 %v2521_v4  ;;  %v2838_v26 = vcombine.high %v2799_v5, %v2799_v5  ;;  %v2532_v62 = vld [vmem:[%s3307_s1 + $0xa8] sm:$0xff]   ;;  %s216_s30 = scalar_lea.vmem [#allocation2], %s215_s25  ;;  %s2074_s10 = scalar_lea.sflag [#allocation3], %s215_s25 }
  0x1b   : > { %v278_v19 = vshrl.u32 %v2150_v8, 16  ;;  %v280_v20 = vshll.u32 %v2150_v8, 16  ;;  %v250_v21 = vshrl.u32 %v2146_v9, 16  ;;  %v252_v22 = vshll.u32 %v2146_v9, 16  ;;  %2316 = vmatpush3.bf16.msra.mxu1 %v2528_v45  ;;  %v2534_v9 = vld [vmem:[%s3307_s1 + $0x10] sm:$0xff]   ;;  %v2537_v13 = vld [vmem:[%s3307_s1 + $0x48] sm:$0xff]  }
  0x1c   : > { %v292_v23 = vshrl.u32 %v2152_v10, 16  ;;  %v294_v24 = vshll.u32 %v2152_v10, 16  ;;  %v266_v25 = vshll.u32 %v2148_v15, 16  ;;  %v264_v30 = vshrl.u32 %v2148_v15, 16  ;;  %2317 = vmatprep.subr.bf16.mxu1 %v2531_v61  ;;  %v2535_v10 = vld [vmem:[%s3307_s1 + $0xe0] sm:$0xff]   ;;  %s2086_s6 = sshll.u32 %s216_s30, 4  ;;  %s2087_s6 = int_to_ptr.vmem [resolvable:$true] %s2086_s6 }
  0x1d   : > { %v282_v28 = vrot.slane %v280_v20, 1  ;;  %v254_v29 = vrot.slane %v252_v22, 1  ;;  %v273_v31 = vshll.u32 %v2827_v16, 16  ;;  %2296 = vmatpush3.bf16.msra.mxu0 %v2522_v12  ;;  %v259_v35 = vshll.u32 %v2821_v14, 16  ;;  %v2536_v12 = vld [vmem:[%s3307_s1 + $0xa0] sm:$0xff]   ;;  %v2539_v20 = vld [vmem:[%s3307_s1 + $0xd8] sm:$0xff]  }
  0x1e   : > { %v296_v33 = vrot.slane %v294_v24, 1  ;;  %v268_v34 = vrot.slane %v266_v25, 1  ;;  %v271_v39 = vshrl.u32 %v2827_v16, 16  ;;  %v257_v40 = vshrl.u32 %v2821_v14, 16  ;;  %2297 = vmatprep.subr.bf16.mxu0 %v2525_v32  ;;  %v2541_v22 = vld [vmem:[%s3307_s1 + $0x40] sm:$0xff]   ;;  %v2543_v24 = vld [vmem:[%s3307_s1 + $0xd0] sm:$0xff]  }
  0x1f   : > { %v283_v37 = vor.u32 %v282_v28, %v278_v19  ;;  %v255_v38 = vor.u32 %v254_v29, %v250_v21  ;;  %v275_v42 = vrot.slane %v273_v31, 1  ;;  %v301_v43 = vshll.u32 %v2831_v17, 16  ;;  %2318 = vmatpush3.bf16.msra.mxu1 %v2532_v62  ;;  %v2538_v19 = vld [vmem:[%s3307_s1 + $0x8] sm:$0xff]   ;;  %v2540_v21 = vld [vmem:[%s3307_s1 + $0x98] sm:$0xff]   ;;  %v2544_v25 = vld [vmem:[%s3307_s1 + $0x90] sm:$0xff]   ;;  %s2633_s11 = scalar_lea.vmem %s2087_s6, 16 }
  0x20   : > { %v297_v41 = vor.u32 %v296_v33, %v292_v23  ;;  %v269_v46 = vor.u32 %v268_v34, %v264_v30  ;;  %v261_v47 = vrot.slane %v259_v35, 1  ;;  %v287_v48 = vshll.u32 %v2838_v26, 16  ;;  %2319 = vmatprep.subr.bf16.mxu1 %v2535_v10  ;;  %v2542_v23 = vld [vmem:[%s3307_s1] sm:$0xff]   ;;  %v2545_v28 = vld [vmem:[%s3307_s1 + $0x178] sm:$0xff]   ;;  %v2546_v29 = vld [vmem:[%s3307_s1 + $0xc8] sm:$0xff]   ;;  %p2634_p11 = scmp.ne.s32.totalorder %s2087_s6, %s2633_s11 }
  0x21   : > { %313 = vrot.lane.b32.xlu1 %v283_v37, %s2695_s23  ;;  %305 = vrot.lane.b32.xlu0 %v255_v38, %s2695_s23  ;;  %v2864_v49 = vcombine.high %v2840_v27, %v2840_v27  ;;  %v2154_v50 = vcombine.low %v2840_v27, %v2840_v27  ;;  %v299_v52 = vshrl.u32 %v2831_v17, 16  ;;  %v285_v53 = vshrl.u32 %v2838_v26, 16  ;;  %v2548_v30 = vld [vmem:[%s3307_s1 + $0x88] sm:$0xff]   ;;  %v2550_v31 = vld [vmem:[%s3307_s1 + $0xc0] sm:$0xff]  }
  0x22   : > { %2298 = vmatpush3.bf16.msra.mxu0 %v2526_v36  ;;  %v303_v55 = vrot.slane %v301_v43, 1  ;;  %v289_v56 = vrot.slane %v287_v48, 1  ;;  %v276_v57 = vor.u32 %v275_v42, %v271_v39  ;;  %v262_v58 = vor.u32 %v261_v47, %v257_v40  ;;  %v2552_v32 = vld [vmem:[%s3307_s1 + $0x80] sm:$0xff]   ;;  %p2635_p12 = pnand %p2634_p11, %p2769_p5 }
  0x23   : > { %2299 = vmatprep.subr.bf16.mxu0 %v2529_v51  ;;  %v341_v59 = vshll.u32 %v2864_v49, 16  ;;  %v334_v60 = vshll.u32 %v2154_v50, 16  ;;  %v339_v0 = vshrl.u32 %v2864_v49, 16  ;;  %v332_v4 = vshrl.u32 %v2154_v50, 16  ;;  %2320 = vmatpush3.bf16.msra.mxu1 %v2536_v12  ;;  %v2547_v12 = vld [vmem:[%s3307_s1 + $0x138] sm:$0xff]  }
  0x24   : > { %v304_v63 = vor.u32 %v303_v55, %v299_v52  ;;  %v290_v2 = vor.u32 %v289_v56, %v285_v53  ;;  %2321 = vmatprep.subr.bf16.mxu1 %v2539_v20  ;;  %v2696_v33 = vmov 1983009808   ;;  %v371_v35 = vlaneseq  ;;  %p2636_p13 = pneg %p2635_p12 }
  0x25   : > { %317 = vrot.lane.b32.xlu1 %v297_v41, %s2695_s23  ;;  %309 = vrot.lane.b32.xlu0 %v269_v46, %s2695_s23  ;;  %v343_v3 = vrot.slane %v341_v59, 1  ;;  %v336_v8 = vrot.slane %v334_v60, 1  ;;  %v369_v34 = vunpack.c.l.s4 %v2696_v33  ;;  %v2553_v33 = vld [vmem:[%s3307_s1 + $0x168] sm:$0xff]  }
  0x26   : > { %2300 = vmatpush3.bf16.msra.mxu0 %v2530_v54  ;;  %v2943_v37 = vshrl.u32 %v371_v35, 7 }
  0x27   : > { %2301 = vmatprep.subr.bf16.mxu0 %v2533_v1  ;;  %v344_v15 = vor.u32 %v343_v3, %v339_v0  ;;  %v337_v18 = vor.u32 %v336_v8, %v332_v4  ;;  %2322 = vmatpush3.bf16.msra.mxu1 %v2540_v21  ;;  %v370_v36 = vunpack.c.0.s8 %v369_v34 }
  0x28   : > { %2323 = vmatprep.subr.bf16.mxu1 %v2543_v24 }
  0x29   : > { %311 = vrot.lane.b32.xlu1 %v276_v57, %s2695_s23  ;;  %307 = vrot.lane.b32.xlu0 %v262_v58, %s2695_s23  ;;  %v2950_v42 = vsub.s32 %v370_v36, %v2943_v37 }
  0x2a   : > { %2302 = vmatpush3.bf16.msra.mxu0 %v2534_v9 }
  0x2b   : > { %2303 = vmatprep.subr.bf16.mxu0 %v2537_v13  ;;  %2324 = vmatpush3.bf16.msra.mxu1 %v2544_v25 }
  0x2c   : > { %2325 = vmatprep.subr.bf16.mxu1 %v2546_v29  ;;  %v2551_v29 = vld [vmem:[%s3307_s1 + $0x130] sm:$0xff]  }
  0x2d   : > { %319 = vrot.lane.b32.xlu1 %v304_v63, %s2695_s23  ;;  %315 = vrot.lane.b32.xlu0 %v290_v2, %s2695_s23 }
  0x2e   : > { %2304 = vmatpush3.bf16.msra.mxu0 %v2538_v19 }
  0x2f   : > { %2305 = vmatprep.subr.bf16.mxu0 %v2541_v22  ;;  %2326 = vmatpush3.bf16.msra.mxu1 %v2548_v30 }
  0x30   : > { %2327 = vmatprep.subr.bf16.mxu1 %v2550_v31 }
  0x31   : > { %347 = vrot.lane.b32.xlu1 %v344_v15, %s2695_s23  ;;  %345 = vrot.lane.b32.xlu0 %v337_v18, %s2695_s23 }
  0x32   : > { %2306 = vmatpush3.bf16.msra.mxu0 %v2542_v23 }
  0x33   : > { %2335 = vmatprep.subr.bf16.mxu0 %v2545_v28  ;;  %2328 = vmatpush3.bf16.msra.mxu1 %v2552_v32 }
  0x93   : > { %v314_v38 = vpop.permute.xlu1 %313  ;;  %v306_v39 = vpop.permute.xlu0 %305 }
  0x94   : > { %v352_v40 = vsel %vm321_vm0, %v2821_v14, %v306_v39  ;;  %v356_v41 = vsel %vm321_vm0, %v2838_v26, %v314_v38 }
  0x95   : > { %v2156_v43 = vcombine.low %v2801_v6, %v352_v40  ;;  %v2160_v46 = vcombine.low %v2799_v5, %v356_v41 }
  0x97   : > { %v318_v44 = vpop.permute.xlu1 %317  ;;  %v310_v45 = vpop.permute.xlu0 %309  ;;  %v374_v26 = vrot.slane %v2156_v43, %v2950_v42  ;;  %v424_v54 = vrot.slane %v2160_v46, %v2950_v42  ;;  %v2558_v46 = vld [vmem:[%s3307_s1 + $0x118] sm:$0xff]  }
  0x98   : > { %v358_v47 = vsel %vm321_vm0, %v2831_v17, %v318_v44  ;;  %v354_v48 = vsel %vm321_vm0, %v2827_v16, %v310_v45 }
  0x99   : > { %v2162_v14 = vcombine.low %v2803_v7, %v358_v47  ;;  %v2158_v50 = vcombine.low %v2811_v11, %v354_v48 }
  0x9b   : > { %v449_v51 = vrot.slane %v2162_v14, %v2950_v42  ;;  %v399_v6 = vrot.slane %v2158_v50, %v2950_v42  ;;  %v312_v52 = vpop.permute.xlu1 %311  ;;  %v308_v53 = vpop.permute.xlu0 %307  ;;  %v2561_v14 = vld [vmem:[%s3307_s1 + $0x148] sm:$0xff]  }
  0x9c   : > { %v323_v55 = vsel %vm321_vm0, %v310_v45, %v312_v52  ;;  %v322_v17 = vsel %vm321_vm0, %v306_v39, %v308_v53  ;;  %v2555_v39 = vld [vmem:[%s3307_s1 + $0x160] sm:$0xff]   ;;  %v2557_v45 = vld [vmem:[%s3307_s1 + $0x158] sm:$0xff]   ;;  %v2562_v50 = vld [vmem:[%s3307_s1 + $0x108] sm:$0xff]  }
  0x9d   : > { %v2159_v16 = vcombine.low %v323_v55, %v2799_v5  ;;  %v2157_v56 = vcombine.low %v322_v17, %v2811_v11  ;;  %v2164_v57 = vcombine.low %v374_v26, %v399_v6  ;;  %v2166_v58 = vcombine.low %v424_v54, %v449_v51  ;;  %v2563_v26 = vld [vmem:[%s3307_s1 + $0x140] sm:$0xff]   ;;  %v2565_v52 = vld [vmem:[%s3308_s2 + $0x78] sm:$0xff]   ;;  %v2569_v17 = vld [vmem:[%s3308_s2 + $0x70] sm:$0xff]  }
  0x9e   : > { %v383_v3 = vcombine.low %v354_v48, %v323_v55  ;;  %v2560_v48 = vld [vmem:[%s3307_s1 + $0x110] sm:$0xff]   ;;  %v2564_v51 = vld [vmem:[%s3307_s1 + $0x100] sm:$0xff]   ;;  %v2566_v53 = vld [vmem:[%s3308_s2 + $0xf8] sm:$0xff]   ;;  %2357 = vmatprep.subr.bf16.mxu1 %v2565_v52 }
  0x9f   : > { %v406_v59 = vrot.slane %v2159_v16, %v2950_v42  ;;  %v381_v60 = vrot.slane %v2157_v56, %v2950_v42  ;;  %v320_v61 = vpop.permute.xlu1 %319  ;;  %v316_v62 = vpop.permute.xlu0 %315  ;;  %v576_v63 = vrot.slane %v2164_v57, %v2950_v42  ;;  %v590_v2 = vrot.slane %v2166_v58, %v2950_v42  ;;  %v2567_v54 = vld [vmem:[%s3308_s2 + $0x38] sm:$0xff]   ;;  %v2570_v16 = vld [vmem:[%s3308_s2 + $0xf0] sm:$0xff]   ;;  %v2573_v58 = vld [vmem:[%s3308_s2 + $0x68] sm:$0xff]  }
  0xa0   : > { %v325_v0 = vsel %vm321_vm0, %v318_v44, %v320_v61  ;;  %v324_v1 = vsel %vm321_vm0, %v314_v38, %v316_v62  ;;  %v390_v23 = vrot.slane %v383_v3, %v2950_v42  ;;  %v2554_v38 = vld [vmem:[%s3307_s1 + $0x128] sm:$0xff]   ;;  %v2556_v44 = vld [vmem:[%s3307_s1 + $0x120] sm:$0xff]   ;;  %v2568_v55 = vld [vmem:[%s3308_s2 + $0xb8] sm:$0xff]  }
  0xa1   : > { %v2163_v5 = vcombine.low %v325_v0, %v2840_v27  ;;  %v408_v11 = vcombine.low %v356_v41, %v324_v1  ;;  %v2161_v4 = vcombine.low %v324_v1, %v2803_v7  ;;  %v433_v8 = vcombine.low %v358_v47, %v325_v0  ;;  %v2549_v27 = vld [vmem:[%s3307_s1 + $0x170] sm:$0xff]   ;;  %v2576_v61 = vld [vmem:[%s3308_s2 + $0xa8] sm:$0xff]   ;;  %v2577_v62 = vld [vmem:[%s3308_s2 + $0x60] sm:$0xff]  }
  0xa2   : > { %v599_v9 = vcombine.high %v576_v63, %v590_v2  ;;  %v598_v10 = vcombine.low %v576_v63, %v590_v2  ;;  %v2165_v7 = vcombine.low %v381_v60, %v406_v59  ;;  %v2559_v47 = vld [vmem:[%s3307_s1 + $0x150] sm:$0xff]   ;;  %v2574_v59 = vld [vmem:[%s3308_s2 + $0xe8] sm:$0xff]   ;;  %v2578_v63 = vld [vmem:[%s3308_s2 + $0xe0] sm:$0xff]  }
  0xa3   : > { %v456_v13 = vrot.slane %v2163_v5, %v2950_v42  ;;  %v415_v15 = vrot.slane %v408_v11, %v2950_v42  ;;  %v431_v18 = vrot.slane %v2161_v4, %v2950_v42  ;;  %v348_v19 = vpop.permute.xlu1 %347  ;;  %v346_v20 = vpop.permute.xlu0 %345  ;;  %v440_v28 = vrot.slane %v433_v8, %v2950_v42  ;;  %v2571_v56 = vld [vmem:[%s3308_s2 + $0x30] sm:$0xff]   ;;  %v2575_v60 = vld [vmem:[%s3308_s2 + $0x28] sm:$0xff]   ;;  %v2579_v0 = vld [vmem:[%s3308_s2 + $0x20] sm:$0xff]  }
  0xa4   : > { %946 = vmatprep.mubr.bf16.mxu0 %v599_v9  ;;  %v349_v21 = vsel %vm321_vm0, %v346_v20, %v348_v19  ;;  %v360_v22 = vsel %vm321_vm0, %v2864_v49, %v346_v20  ;;  %v583_v32 = vrot.slane %v2165_v7, %v2950_v42  ;;  %v2572_v57 = vld [vmem:[%s3308_s2 + $0xb0] sm:$0xff]   ;;  %v2580_v1 = vld [vmem:[%s3308_s2 + $0xa0] sm:$0xff]   ;;  %v2581_v2 = vld [vmem:[%s3308_s2 + $0x58] sm:$0xff]  }
  0xa5   : > { %v458_v24 = vcombine.low %v360_v22, %v349_v21  ;;  %947 = vmatmul.mubr.bf16.vlgmr.msra.gmra.mxu0 %v598_v10  ;;  %v2167_v25 = vcombine.low %v431_v18, %v456_v13  ;;  %v602_v30 = vcombine.low %v390_v23, %v415_v15  ;;  %v2582_v3 = vld [vmem:[%s3308_s2 + $0xd8] sm:$0xff]   ;;  %v2585_v4 = vld [vmem:[%s3308_s2 + $0x50] sm:$0xff]   ;;  %v2590_v13 = vld [vmem:[%s3308_s2 + $0xc8] sm:$0xff]  }
  0xa6   : > { %2336 = vmatpush3.bf16.msra.mxu0 %v2547_v12  ;;  %v2583_v5 = vld [vmem:[%s3308_s2 + $0x18] sm:$0xff]   ;;  %v2586_v8 = vld [vmem:[%s3308_s2 + $0xd0] sm:$0xff]   ;;  %v2589_v12 = vld [vmem:[%s3308_s2 + $0x48] sm:$0xff]  }
  0xa7   : > { %v465_v31 = vrot.slane %v458_v24, %v2950_v42  ;;  %2337 = vmatprep.subr.bf16.mxu0 %v2549_v27  ;;  %v597_v49 = vrot.slane %v2167_v25, %v2950_v42  ;;  %v610_v40 = vrot.slane %v602_v30, %v2950_v42  ;;  %v2584_v11 = vld [vmem:[%s3308_s2 + $0x98] sm:$0xff]   ;;  %v2587_v9 = vld [vmem:[%s3308_s2 + $0x10] sm:$0xff]   ;;  %v2591_v15 = vld [vmem:[%s3308_s2 + $0x8] sm:$0xff]  }
  0xa8   : > { %v2588_v10 = vld [vmem:[%s3308_s2 + $0x90] sm:$0xff]   ;;  %v2592_v18 = vld [vmem:[%s3308_s2 + $0x88] sm:$0xff]   ;;  %v2593_v19 = vld [vmem:[%s3308_s2 + $0x40] sm:$0xff]  }
  0xa9   : > { %v603_v34 = vcombine.low %v440_v28, %v465_v31  ;;  %v601_v35 = vcombine.high %v583_v32, %v597_v49  ;;  %v600_v36 = vcombine.low %v583_v32, %v597_v49  ;;  %v2594_v20 = vld [vmem:[%s3308_s2 + $0xc0] sm:$0xff]   ;;  %v564_v28 = vsub.s32 0, %v2943_v37 }
  0xaa   : > { %2338 = vmatpush3.bf16.msra.mxu0 %v2551_v29  ;;  %v2595_v27 = vld [vmem:[%s3308_s2] sm:$0xff]  }
  0xab   : > { %987 = vmatprep.mubr.bf16.mxu1 %v601_v35  ;;  %2339 = vmatprep.subr.bf16.mxu0 %v2553_v33  ;;  %v617_v41 = vrot.slane %v603_v34, %v2950_v42  ;;  %v2596_v7 = vld [vmem:[%s3308_s2 + $0x80] sm:$0xff]  }
  0xac   : > { %988 = vmatmul.mubr.bf16.vlgmr.msra.gmra.mxu1 %v600_v36  ;;  %v3134_v29 = vld [vmem:[%s3310_s4] sm:$0x7] }
  0xad   : > { %v619_v43 = vcombine.high %v610_v40, %v617_v41  ;;  %v618_v6 = vcombine.low %v610_v40, %v617_v41  ;;  %2358 = vmatpush3.bf16.msra.mxu1 %v2567_v54  ;;  %v565_v32 = vrot.slane %v3134_v29, %v564_v28 }
  0xae   : > { %2340 = vmatpush3.bf16.msra.mxu0 %v2554_v38  ;;  %2359 = vmatprep.subr.bf16.mxu1 %v2569_v17 }
  0xaf   : > { %2341 = vmatprep.subr.bf16.mxu0 %v2555_v39  ;;  %1028 = vmatprep.mubr.bf16.mxu0 %v619_v43 }
  0xb1   : > { %2360 = vmatpush3.bf16.msra.mxu1 %v2571_v56 }
  0xb2   : > { %2342 = vmatpush3.bf16.msra.mxu0 %v2556_v44  ;;  %2361 = vmatprep.subr.bf16.mxu1 %v2573_v58 }
  0xb3   : > { %2343 = vmatprep.subr.bf16.mxu0 %v2557_v45 }
  0xb5   : > { %2362 = vmatpush3.bf16.msra.mxu1 %v2575_v60 }
  0xb6   : > { %2344 = vmatpush3.bf16.msra.mxu0 %v2558_v46  ;;  %2363 = vmatprep.subr.bf16.mxu1 %v2577_v62 }
  0xb7   : > { %2345 = vmatprep.subr.bf16.mxu0 %v2559_v47 }
  0xb9   : > { %2364 = vmatpush3.bf16.msra.mxu1 %v2579_v0 }
  0xba   : > { %2346 = vmatpush3.bf16.msra.mxu0 %v2560_v48  ;;  %2365 = vmatprep.subr.bf16.mxu1 %v2581_v2 }
  0xbb   : > { %2347 = vmatprep.subr.bf16.mxu0 %v2561_v14 }
  0xbd   : > { %2366 = vmatpush3.bf16.msra.mxu1 %v2583_v5 }
  0xbe   : > { %2348 = vmatpush3.bf16.msra.mxu0 %v2562_v50  ;;  %2367 = vmatprep.subr.bf16.mxu1 %v2585_v4 }
  0xbf   : > { %2349 = vmatprep.subr.bf16.mxu0 %v2563_v26 }
  0xc1   : > { %2368 = vmatpush3.bf16.msra.mxu1 %v2587_v9 }
  0xc2   : > { %2350 = vmatpush3.bf16.msra.mxu0 %v2564_v51  ;;  %2369 = vmatprep.subr.bf16.mxu1 %v2589_v12 }
  0xc3   : > { %2379 = vmatprep.subr.bf16.mxu0 %v2566_v53 }
  0xc5   : > { %1029 = vmatmul.mubr.bf16.vlgmr.msra.gmra.mxu0 %v618_v6  ;;  %2370 = vmatpush3.bf16.msra.mxu1 %v2591_v15 }
  0xc6   : > { %2380 = vmatpush3.bf16.msra.mxu0 %v2568_v55  ;;  %2371 = vmatprep.subr.bf16.mxu1 %v2593_v19  ;;  %v2697_v55 = vmov 1966171168  }
  0xc7   : > { %2381 = vmatprep.subr.bf16.mxu0 %v2570_v16  ;;  %v1117_v17 = vunpack.c.l.s4 %v2697_v55 }
  0xc9   : > { %2372 = vmatpush3.bf16.msra.mxu1 %v2595_v27  ;;  %v1118_v2 = vunpack.c.0.s8 %v1117_v17 }
  0xca   : > { %2382 = vmatpush3.bf16.msra.mxu0 %v2572_v57 }
  0xcb   : > { %2383 = vmatprep.subr.bf16.mxu0 %v2574_v59  ;;  %v1121_v19 = vsub.s32 %v1118_v2, %v2943_v37  ;;  %v2609_v2 = vld [vmem:[%s3309_s3 + $0xe8] sm:$0xff]  }
  0xce   : > { %2384 = vmatpush3.bf16.msra.mxu0 %v2576_v61 }
  0xcf   : > { %2385 = vmatprep.subr.bf16.mxu0 %v2578_v63 }
  0xd2   : > { %2386 = vmatpush3.bf16.msra.mxu0 %v2580_v1 }
  0xd3   : > { %2387 = vmatprep.subr.bf16.mxu0 %v2582_v3 }
  0xd6   : > { %2388 = vmatpush3.bf16.msra.mxu0 %v2584_v11 }
  0xd7   : > { %2389 = vmatprep.subr.bf16.mxu0 %v2586_v8 }
  0xda   : > { %2390 = vmatpush3.bf16.msra.mxu0 %v2588_v10 }
  0xdb   : > { %2391 = vmatprep.subr.bf16.mxu0 %v2590_v13 }
  0xde   : > { %2392 = vmatpush3.bf16.msra.mxu0 %v2592_v18 }
  0xdf   : > { %2393 = vmatprep.subr.bf16.mxu0 %v2594_v20 }
  0xe2   : > { %2394 = vmatpush3.bf16.msra.mxu0 %v2596_v7 }
 0x165   : > { %v2307_v21 = vpop.f32.mrf.mxu0 }
 0x167   : > { %v2308_v23 = vpop.f32.mrf.mxu0 }
 0x168   : > { %v2309_v49 = vadd.f32 %v2308_v23, %v2307_v21 }
 0x169   : > { %v2310_v25 = vpop.f32.mrf.mxu0 }
 0x16a   : > { %v949_v39 = vadd.f32 %v2309_v49, %v565_v32 }
 0x16b   : > { %v2311_v31 = vpop.f32.mrf.mxu0 }
 0x16c   : > { %v2329_v22 = vpop.f32.mrf.mxu1  ;;  %v2312_v35 = vadd.f32 %v2311_v31, %v2310_v25 }
 0x16e   : > { %v2330_v24 = vpop.f32.mrf.mxu1  ;;  %v952_v44 = vadd.f32 %v2312_v35, %v565_v32 }
 0x16f   : > { %v2331_v36 = vadd.f32 %v2330_v24, %v2329_v22 }
 0x170   : > { %v2332_v30 = vpop.f32.mrf.mxu1 }
 0x171   : > { %v990_v45 = vadd.f32 %v2331_v36, %v949_v39 }
 0x172   : > { %v2333_v33 = vpop.f32.mrf.mxu1 }
 0x173   : > { %v2334_v40 = vadd.f32 %v2333_v33, %v2332_v30 }
 0x175   : > { %v993_v47 = vadd.f32 %v2334_v40, %v952_v44 }
 0x185   : > { %v2351_v34 = vpop.f32.mrf.mxu0 }
 0x187   : > { %v2352_v38 = vpop.f32.mrf.mxu0 }
 0x188   : > { %v2353_v41 = vadd.f32 %v2352_v38, %v2351_v34 }
 0x189   : > { %v2354_v43 = vpop.f32.mrf.mxu0 }
 0x18a   : > { %v1031_v48 = vadd.f32 %v2353_v41, %v990_v45 }
 0x18b   : > { %v2355_v46 = vpop.f32.mrf.mxu0 }
 0x18c   : > { %v2356_v14 = vadd.f32 %v2355_v46, %v2354_v43  ;;  %v1037_v26 = vmax.f32 %v1031_v48, 0.0 }
 0x18e   : > { %v1034_v50 = vadd.f32 %v2356_v14, %v993_v47 }
 0x190   : > { %v1038_v51 = vmax.f32 %v1034_v50, 0.0 }
 0x192   : > { %v1039_v6 = vpack.c.bf16 %v1038_v51, %v1037_v26  ;;  %v2216_v52 = vpack.c.bf16 %v1038_v51, %v1038_v51 }
 0x194   : > { %v1048_v53 = vrot.slane %v1039_v6, %v2950_v42  ;;  %v1055_v54 = vrot.slane %v2216_v52, %v2950_v42 }
 0x196   : > { %v1056_v16 = vcombine.high %v1048_v53, %v1048_v53  ;;  %v1057_v56 = vcombine.high %v1055_v54, %v1055_v54  ;;  %v1064_v57 = vrot.slane %v1048_v53, %v2950_v42  ;;  %v1078_v58 = vrot.slane %v1055_v54, %v2950_v42 }
 0x198   : > { %v1071_v59 = vrot.slane %v1056_v16, %v2950_v42  ;;  %v1082_v60 = vshll.u32 %v1064_v57, 16  ;;  %v1096_v61 = vshll.u32 %v1078_v58, 16  ;;  %v1106_v62 = vrot.slane %v1057_v56, %v2950_v42 }
 0x199   : > { %v1080_v63 = vshrl.u32 %v1064_v57, 16  ;;  %v1094_v3 = vshrl.u32 %v1078_v58, 16  ;;  %v2597_v57 = vld [vmem:[%s3309_s3 + $0x78] sm:$0xff]  }
 0x19a   : > { %v1084_v0 = vrot.slane %v1082_v60, 1  ;;  %v1089_v1 = vshll.u32 %v1071_v59, 16  ;;  %v1098_v5 = vrot.slane %v1096_v61, 1  ;;  %v1110_v11 = vshll.u32 %v1106_v62, 16  ;;  %v2598_v58 = vld [vmem:[%s3309_s3 + $0x38] sm:$0xff]   ;;  %2401 = vmatprep.subr.bf16.mxu1 %v2597_v57 }
 0x19b   : > { %v1087_v8 = vshrl.u32 %v1071_v59, 16  ;;  %v1108_v12 = vshrl.u32 %v1106_v62, 16  ;;  %v2599_v59 = vld [vmem:[%s3309_s3 + $0x70] sm:$0xff]   ;;  %v2601_v60 = vld [vmem:[%s3309_s3 + $0xf8] sm:$0xff]  }
 0x19c   : > { %v1085_v4 = vor.u32 %v1084_v0, %v1080_v63  ;;  %v1091_v9 = vrot.slane %v1089_v1, 1  ;;  %v1099_v10 = vor.u32 %v1098_v5, %v1094_v3  ;;  %v1112_v13 = vrot.slane %v1110_v11, 1  ;;  %v2602_v61 = vld [vmem:[%s3309_s3 + $0xb8] sm:$0xff]   ;;  %v2605_v62 = vld [vmem:[%s3309_s3 + $0xf0] sm:$0xff]   ;;  %2423 = vmatprep.subr.bf16.mxu0 %v2601_v60  ;;  %v2603_v0 = vld [vmem:[%s3309_s3 + $0x68] sm:$0xff]  }
 0x19d   : > { %v2600_v63 = vld [vmem:[%s3309_s3 + $0x30] sm:$0xff]   ;;  %v2604_v3 = vld [vmem:[%s3309_s3 + $0x28] sm:$0xff]   ;;  %v2607_v5 = vld [vmem:[%s3309_s3 + $0x60] sm:$0xff]  }
 0x19e   : > { %v1092_v15 = vor.u32 %v1091_v9, %v1087_v8  ;;  %v1114_v18 = vcombine.low %v1048_v53, %v1085_v4  ;;  %v1113_v20 = vor.u32 %v1112_v13, %v1108_v12  ;;  %v1146_v27 = vcombine.low %v1055_v54, %v1099_v10  ;;  %v2606_v1 = vld [vmem:[%s3309_s3 + $0xb0] sm:$0xff]   ;;  %v2610_v11 = vld [vmem:[%s3309_s3 + $0xa8] sm:$0xff]   ;;  %v2613_v4 = vld [vmem:[%s3309_s3 + $0xe0] sm:$0xff]  }
 0x19f   : > { %v2608_v8 = vld [vmem:[%s3309_s3 + $0x20] sm:$0xff]   ;;  %v2611_v9 = vld [vmem:[%s3309_s3 + $0x58] sm:$0xff]  }
 0x1a0   : > { %v1115_v42 = vcombine.low %v1056_v16, %v1092_v15  ;;  %v1170_v7 = vcombine.low %v1057_v56, %v1113_v20  ;;  %v1122_v21 = vrot.slane %v1114_v18, %v1121_v19  ;;  %v1153_v23 = vrot.slane %v1146_v27, %v1121_v19  ;;  %v2614_v10 = vld [vmem:[%s3309_s3 + $0xa0] sm:$0xff]   ;;  %v2617_v12 = vld [vmem:[%s3309_s3 + $0xd8] sm:$0xff]   ;;  %v2615_v15 = vld [vmem:[%s3309_s3 + $0x50] sm:$0xff]  }
 0x1a1   : > { %v2612_v13 = vld [vmem:[%s3309_s3 + $0x18] sm:$0xff]   ;;  %v2616_v20 = vld [vmem:[%s3309_s3 + $0x10] sm:$0xff]   ;;  %v2619_v27 = vld [vmem:[%s3309_s3 + $0x48] sm:$0xff]  }
 0x1a2   : > { %v1129_v22 = vrot.slane %v1115_v42, %v1121_v19  ;;  %v1177_v24 = vrot.slane %v1170_v7, %v1121_v19  ;;  %v2618_v18 = vld [vmem:[%s3309_s3 + $0x98] sm:$0xff]   ;;  %v2622_v42 = vld [vmem:[%s3309_s3 + $0x90] sm:$0xff]   ;;  %v2620_v7 = vld [vmem:[%s3309_s3 + $0x8] sm:$0xff]  }
 0x1a4   : > { %v1130_v25 = vcombine.low %v1122_v21, %v1129_v22  ;;  %v1131_v28 = vcombine.high %v1122_v21, %v1129_v22  ;;  %v1154_v30 = vcombine.low %v1129_v22, %v1153_v23  ;;  %v1155_v31 = vcombine.high %v1129_v22, %v1153_v23  ;;  %v2623_v21 = vld [vmem:[%s3309_s3 + $0x40] sm:$0xff]  }
 0x1a5   : > { %v1179_v32 = vcombine.high %v1153_v23, %v1177_v24  ;;  %v1178_v34 = vcombine.low %v1153_v23, %v1177_v24  ;;  %v1269_v22 = vsub.s32 1, %v2943_v37 }
 0x1a6   : > { %v1145_v49 = vrot.slane %v1131_v28, %v1121_v19  ;;  %v1162_v33 = vrot.slane %v1154_v30, %v1121_v19  ;;  %v1138_v36 = vrot.slane %v1130_v25, %v1121_v19  ;;  %v1169_v38 = vrot.slane %v1155_v31, %v1121_v19 }
 0x1a7   : > { %v1193_v35 = vrot.slane %v1179_v32, %v1121_v19  ;;  %v1186_v43 = vrot.slane %v1178_v34, %v1121_v19  ;;  %v1270_v25 = vrot.slane %v3134_v29, %v1269_v22  ;;  %v2624_v34 = vld [vmem:[%s3309_s3] sm:$0xff]  }
 0x1a8   : > { %v1198_v39 = vunpack.i.h.s16 %v1162_v33  ;;  %v2217_v40 = vpack.i.b16 %v1162_v33, %v1145_v49 }
 0x1a9   : > { %v1202_v41 = vunpack.i.l.s16 %v1193_v35  ;;  %v2625_v35 = vld [vmem:[%s3309_s3 + $0xc8] sm:$0xff]  }
 0x1aa   : > { %v2218_v44 = vpack.i.b16 %v1169_v38, %v1198_v39  ;;  %v1276_v45 = vcombine.low %v1138_v36, %v2217_v40  ;;  %v2626_v38 = vld [vmem:[%s3309_s3 + $0x88] sm:$0xff]  }
 0x1ab   : > { %v1298_v46 = vrot.slane %v1202_v41, %v1121_v19  ;;  %v2698_v41 = vmov 0.0  }
 0x1ac   : > { %v1277_v47 = vcombine.low %v2218_v44, %v1186_v43  ;;  %v1284_v48 = vrot.slane %v1276_v45, %v1121_v19 }
 0x1ad   : > { %v1301_v50 = vcombine.high %v1298_v46, %v1298_v46  ;;  %v1322_v54 = vrot.slane %v1298_v46, %v1121_v19  ;;  %v2627_v46 = vld [vmem:[%s3309_s3 + $0xc0] sm:$0xff]  }
 0x1ae   : > { %v1291_v14 = vrot.slane %v1277_v47, %v1121_v19  ;;  %v2629_v47 = vld [vmem:[%s3309_s3 + $0x80] sm:$0xff]  }
 0x1af   : > { %v1329_v52 = vrot.slane %v1301_v50, %v1121_v19 }
 0x1b0   : > { %v1300_v26 = vcombine.high %v1284_v48, %v1291_v14  ;;  %v1299_v51 = vcombine.low %v1284_v48, %v1291_v14 }
 0x1b2   : > { %v1315_v6 = vrot.slane %v1300_v26, %v1121_v19  ;;  %v1308_v53 = vrot.slane %v1299_v51, %v1121_v19  ;;  %v2621_v19 = vld [vmem:[%s3309_s3 + $0xd0] sm:$0xff]  }
 0x1b4   : > { %v1332_v55 = vcombine.low %v1315_v6, %v1329_v52  ;;  %v1333_v17 = vcombine.high %v1315_v6, %v1329_v52  ;;  %v1330_v16 = vcombine.low %v1308_v53, %v1322_v54  ;;  %v1331_v56 = vcombine.high %v1308_v53, %v1322_v54 }
 0x1b6   : > { %1562 = vmatprep.mubr.bf16.mxu1 %v1332_v55  ;;  %1603 = vmatprep.mubr.bf16.mxu0 %v1333_v17 }
 0x1b7   : > { %1563 = vmatmul.mubr.bf16.vlgmr.msra.gmra.mxu1 %v1330_v16  ;;  %1604 = vmatmul.mubr.bf16.vlgmr.msra.gmra.mxu0 %v1331_v56  ;;  %v2628_v16 = vld [vmem:[%s3309_s3 + $0x118] sm:$0xff]  }
 0x1b8   : > { %2402 = vmatpush3.bf16.msra.mxu1 %v2598_v58  ;;  %2424 = vmatpush3.bf16.msra.mxu0 %v2602_v61 }
 0x1b9   : > { %2403 = vmatprep.subr.bf16.mxu1 %v2599_v59  ;;  %2425 = vmatprep.subr.bf16.mxu0 %v2605_v62  ;;  %v2630_v62 = vld [vmem:[%s3309_s3 + $0x110] sm:$0xff]  }
 0x1bc   : > { %2404 = vmatpush3.bf16.msra.mxu1 %v2600_v63  ;;  %2426 = vmatpush3.bf16.msra.mxu0 %v2606_v1  ;;  %v2631_v1 = vld [vmem:[%s3309_s3 + $0x108] sm:$0xff]  }
 0x1bd   : > { %2405 = vmatprep.subr.bf16.mxu1 %v2603_v0  ;;  %2427 = vmatprep.subr.bf16.mxu0 %v2609_v2  ;;  %v2632_v2 = vld [vmem:[%s3309_s3 + $0x100] sm:$0xff]  }
 0x1c0   : > { %2406 = vmatpush3.bf16.msra.mxu1 %v2604_v3  ;;  %2428 = vmatpush3.bf16.msra.mxu0 %v2610_v11 }
 0x1c1   : > { %2407 = vmatprep.subr.bf16.mxu1 %v2607_v5  ;;  %2429 = vmatprep.subr.bf16.mxu0 %v2613_v4 }
 0x1c4   : > { %2408 = vmatpush3.bf16.msra.mxu1 %v2608_v8  ;;  %2430 = vmatpush3.bf16.msra.mxu0 %v2614_v10 }
 0x1c5   : > { %2409 = vmatprep.subr.bf16.mxu1 %v2611_v9  ;;  %2431 = vmatprep.subr.bf16.mxu0 %v2617_v12 }
 0x1c8   : > { %2410 = vmatpush3.bf16.msra.mxu1 %v2612_v13  ;;  %2432 = vmatpush3.bf16.msra.mxu0 %v2618_v18  ;;  %v1938_v13 = vrot.slane %v3134_v29, 2 }
 0x1c9   : > { %2411 = vmatprep.subr.bf16.mxu1 %v2615_v15  ;;  %2433 = vmatprep.subr.bf16.mxu0 %v2621_v19 }
 0x1cc   : > { %2412 = vmatpush3.bf16.msra.mxu1 %v2616_v20  ;;  %2434 = vmatpush3.bf16.msra.mxu0 %v2622_v42 }
 0x1cd   : > { %2413 = vmatprep.subr.bf16.mxu1 %v2619_v27  ;;  %2435 = vmatprep.subr.bf16.mxu0 %v2625_v35 }
 0x1d0   : > { %2414 = vmatpush3.bf16.msra.mxu1 %v2620_v7  ;;  %2436 = vmatpush3.bf16.msra.mxu0 %v2626_v38 }
 0x1d1   : > { %2415 = vmatprep.subr.bf16.mxu1 %v2623_v21  ;;  %2437 = vmatprep.subr.bf16.mxu0 %v2627_v46 }
 0x1d4   : > { %2416 = vmatpush3.bf16.msra.mxu1 %v2624_v34  ;;  %2438 = vmatpush3.bf16.msra.mxu0 %v2629_v47 }
 0x1d5   : > { %2450 = vmatprep.subr.bf16.mxu1 %v2698_v41 }
 0x277   : > { %v2373_v23 = vpop.f32.mrf.mxu1  ;;  %v2395_v24 = vpop.f32.mrf.mxu0 }
 0x279   : > { %v2374_v28 = vpop.f32.mrf.mxu1  ;;  %v2396_v30 = vpop.f32.mrf.mxu0 }
 0x27a   : > { %v2375_v31 = vadd.f32 %v2374_v28, %v2373_v23  ;;  %v2397_v39 = vadd.f32 %v2396_v30, %v2395_v24 }
 0x27b   : > { %v2376_v32 = vpop.f32.mrf.mxu1  ;;  %v2398_v49 = vpop.f32.mrf.mxu0 }
 0x27c   : > { %v1565_v33 = vadd.f32 %v2375_v31, %v1270_v25 }
 0x27d   : > { %v2377_v36 = vpop.f32.mrf.mxu1  ;;  %v2399_v37 = vpop.f32.mrf.mxu0 }
 0x27e   : > { %v2378_v40 = vadd.f32 %v2377_v36, %v2376_v32  ;;  %v1606_v43 = vadd.f32 %v2397_v39, %v1565_v33  ;;  %v2400_v45 = vadd.f32 %v2399_v37, %v2398_v49 }
 0x280   : > { %v1568_v44 = vadd.f32 %v2378_v40, %v1270_v25  ;;  %v1612_v14 = vmax.f32 %v1606_v43, 0.0 }
 0x282   : > { %v1609_v48 = vadd.f32 %v2400_v45, %v1568_v44 }
 0x284   : > { %v1613_v50 = vmax.f32 %v1609_v48, 0.0 }
 0x286   : > { %v1614_v26 = vpack.c.bf16 %v1613_v50, %v1612_v14 }
 0x288   : > { %v1616_v51 = vshrl.u32 %v1614_v26, 16  ;;  %v1621_v55 = vrot.slane %v1614_v26, 1  ;;  %v1629_v59 = vrot.slane %v1614_v26, 3  ;;  %v1625_v60 = vrot.slane %v1614_v26, 2 }
 0x289   : > { %v1633_v3 = vrot.slane %v1614_v26, 4 }
 0x28a   : > { %1618 = vrot.lane.b32.xlu1 %v1616_v51, %s2695_s23  ;;  %v1622_v6 = vrot.slane %v1616_v51, 1  ;;  %v1626_v52 = vrot.slane %v1616_v51, 2  ;;  %v1630_v53 = vrot.slane %v1616_v51, 3 }
 0x28c   : > { %1623 = vrot.lane.b32.xlu0 %v1622_v6, %s2695_s23 }
 0x28e   : > { %1627 = vrot.lane.b32.xlu1 %v1626_v52, %s2695_s23 }
 0x290   : > { %1631 = vrot.lane.b32.xlu0 %v1630_v53, %s2695_s23 }
 0x2fc   : > { %v1619_v54 = vpop.permute.xlu1 %1618 }
 0x2fd   : > { %v1635_v57 = vsel %vm321_vm0, %v1614_v26, %v1619_v54 }
 0x2fe   : > { %v1624_v17 = vpop.permute.xlu0 %1623 }
 0x2ff   : > { %v1639_v56 = vsel %vm321_vm0, %v1621_v55, %v1624_v17 }
 0x300   : > { %1975 = vmatprep.mubr.bf16.mxu1 %v1639_v56  ;;  %v1628_v58 = vpop.permute.xlu1 %1627 }
 0x301   : > { %1976 = vmatmul.mubr.bf16.vlgmr.msra.gmra.mxu1 %v1635_v57  ;;  %v1643_v0 = vsel %vm321_vm0, %v1625_v60, %v1628_v58 }
 0x302   : > { %2451 = vmatpush3.bf16.msra.mxu1 %v2628_v16  ;;  %v1632_v61 = vpop.permute.xlu0 %1631  ;;  %2458 = vmatprep.mubr.msk.bf16.mxu1 %vm2699_vm1, %v2698_v41 }
 0x303   : > { %v1647_v63 = vsel %vm321_vm0, %v1629_v59, %v1632_v61  ;;  %2452 = vmatprep.subr.bf16.mxu1 %v2698_v41 }
 0x304   : > { %2015 = vmatprep.mubr.bf16.mxu0 %v1647_v63 }
 0x305   : > { %2016 = vmatmul.mubr.bf16.vlgmr.msra.gmra.mxu0 %v1643_v0 }
 0x306   : > { %2453 = vmatpush3.bf16.msra.mxu1 %v2630_v62 }
 0x307   : > { %2454 = vmatprep.subr.bf16.mxu1 %v2698_v41 }
 0x30a   : > { %2455 = vmatpush3.bf16.msra.mxu1 %v2631_v1 }
 0x30b   : > { %2456 = vmatprep.subr.bf16.mxu1 %v2698_v41 }
 0x30e   : > { %2457 = vmatpush3.bf16.msra.mxu1 %v2632_v2 }
 0x311   : > { %2459 = vmatmul.mubr.msk.bf16.vlgmr.msra.gmra.mxu1 %vm321_vm0, %v1633_v3 }
 0x3c1   : > { %v2417_v5 = vpop.f32.mrf.mxu1 }
 0x3c3   : > { %v2418_v11 = vpop.f32.mrf.mxu1 }
 0x3c4   : > { %v2419_v15 = vadd.f32 %v2418_v11, %v2417_v5 }
 0x3c5   : > { %v2420_v4 = vpop.f32.mrf.mxu1  ;;  %v2439_v8 = vpop.f32.mrf.mxu0 }
 0x3c6   : > { %v1978_v20 = vadd.f32 %v2419_v15, %v1938_v13 }
 0x3c7   : > { %v2421_v9 = vpop.f32.mrf.mxu1  ;;  %v2440_v10 = vpop.f32.mrf.mxu0 }
 0x3c8   : > { %v2441_v19 = vadd.f32 %v2440_v10, %v2439_v8 }
 0x3c9   : > { %v2442_v12 = vpop.f32.mrf.mxu0 }
 0x3ca   : > { %v2018_v27 = vadd.f32 %v2441_v19, %v1978_v20 }
 0x3cb   : > { %v2443_v18 = vpop.f32.mrf.mxu0 }
 0x3d1   : > { %v2057_v42 = vpop.f32.mrf.mxu1 }
 0x3d2   : > { %v2058_v7 = vadd.f32 %v2057_v42, %v2018_v27 }
 0x3d3   : > { %v2460_v21 = vpop.f32.mrf.mxu1 }
 0x3d4   : > { %v2063_v22 = vmax.f32 %v2058_v7, 0.0 }
 0x3d5   : > { %v2060_v23 = vpop.f32.mrf.mxu1 }
 0x3d6   : > { %v2065_v24 = vsel %vm2064_vm2, %v2063_v22, 0.0 }
 0x3d7   : > { %v2461_v25 = vpop.f32.mrf.mxu1  ;;  %v2067_v28 = vrot.slane %v2065_v24, 1 }
 0x3d9   : > { %2068 = vrot.lane.b32.xlu0 %v2067_v28, %s2695_s23  ;;  %s2700_s23 = smov [#allocation2]  }
 0x3da   : > { %s2637_s22 = sshll.u32 %s2700_s23, 4  ;;  %s2638_s22 = int_to_ptr.vmem [resolvable:$false] %s2637_s22 }
 0x3db   : > { %s2639_s12 = scalar_lea.vmem %s2638_s22, 32  ;;  %p2640_p0 = scmp.lt.s32.totalorder %s2087_s6, %s2638_s22 }
 0x3dc   : > { %p2641_p1 = scmp.lt.s32.totalorder %s2639_s12, %s2633_s11 }
 0x3de   : > { %p2642_p2 = por %p2641_p1, %p2640_p0 }
 0x3e0   : > { %p2643_p3 = pnand %p2642_p2, %p2636_p13 }
 0x44b   : > { %v2069_v29 = vpop.permute.xlu0 %2068 }
 0x44c   : > { %v2071_v30 = vsel %vm321_vm0, %v2065_v24, %v2069_v29 }
 0x44d   : > { %2072 = vst [vmem:[%s216_s30] sm:$0x1] %v2071_v30 }
 0x44e   : > { %2646 = shalt.err (!%p2643_p3)
}
 0x44f   : > { %s2647_s13 = scalar_lea.hbm %s3270_s9, 16  ;;  %s2651_s16 = scalar_lea.hbm %s3311_s5, 32 }
 0x450   : > { %p2648_p4 = scmp.ne.s32.totalorder %s3270_s9, %s2647_s13  ;;  %p2652_p9 = scmp.lt.s32.totalorder %s3270_s9, %s3311_s5 }
 0x451   : > { %p2653_p10 = scmp.lt.s32.totalorder %s2651_s16, %s2647_s13 }
 0x452   : > { %p2649_p7 = pnand %p2648_p4, %p2769_p5 }
 0x453   : > { %p2654_p11 = por %p2653_p10, %p2652_p9 }
 0x454   : > { %p2650_p8 = pneg %p2649_p7 }
 0x456   : > { %p2655_p12 = pnand %p2654_p11, %p2650_p8 }
 0x458   : > { %2658 = shalt.err (!%p2655_p12)
}
 0x459   : > { %2463 = dma.vmem_to_hbm [thread:$0]  (%p2769_p5), %s2087_s6, 16, %s3270_s9, %s2074_s10  }
 0x45a PF: > { %p2469_p13 = scmp.ge.s32.totalorder %s2693_s21, 2  ;;  %s2098_s26 = sand.u32 1, %s2681_s18  }
 0x45b   : > { %s2099_s30 = scalar_lea.sflag [#allocation3], %s2098_s26 }
 0x45c   : > { %p2466_p0 = pnand %p2469_p13, %p2773_p6 }
 0x45e   : > { %p2467_p1 = pneg %p2466_p0 }
 0x460   : > { %2676 = dma.done.wait (%p2467_p1), %s2099_s30, 16  }
 0x461   : > { %2678 = vsyncadd (%p2467_p1), %s2099_s30, 4294967280  ;;  %p15_p2 = scmp.ge.s32.totalorder %s2756_s24, 4   ;;  %s3314_s18 = smov %s2685_s19 }
 0x462   : > { %s3315_s19 = smov %s2689_s20  ;;  %s3316_s20 = smov %s2767_s27 }
 0x463   : > { %s3317_s21 = smov %s2756_s24  ;;  %17 = sbr.rel (!%p15_p2) target bundleno = 3 (0x3), region = 75 }
 0x468   :  { %2103 = vsyncpa [#allocation3], 1 }
 0x469   :  { %2105 = vsyncpa [#allocation3 + $0x1], 1 }

</bundles_post_ra>
